<compile_context>
chip_gen: v7x
topology: tpu7x:2x2x1
jax: 0.10.0
libtpu: 0.0.40
codegen_flags: <defaults>
</compile_context>

<pallas_src>
import functools
import math

import numpy as np
import jax
import jax.numpy as jnp
from jax.experimental import pallas as pl
from jax.experimental.pallas import tpu as pltpu

BN_EPS = 1e-5
BN_SCALE = float(1.0 / math.sqrt(1.0 + BN_EPS))  # eval-mode BatchNorm1d, default stats
NEG_MASK = -1e30                                 # folded into bias of masked gate lanes


def _round_up(x, m):
    return ((x + m - 1) // m) * m


# ------------------------------ Pallas kernel ------------------------------ #

def _cgc_fused_kernel(xs_ref, w_ref, b_ref, rexp_ref, o_ref, *,
                      domain_num, n_spec, n_shared, H, E, G, EXP_W, OUT_PAD):
    # xs_ref:  (Gin, Bt, D)  bf16  stacked inputs [x_dom0 ... x_dom{n-1}, x_shared]
    # w_ref:   (Gin, D, C)   bf16  per-source packed weights (experts | gate | pad), BN folded
    # b_ref:   (Gin, 1, C)   f32   per-source packed biases; masked gate lanes hold -1e30
    # rexp_ref:(E, E*H)      f32   0/1 lane-expansion matrix (gate weight e -> H lanes)
    # o_ref:   (Bt, OUT_PAD) f32   packed per-gate pooled outputs (lane-dense, padded)
    Gin = domain_num + 1

    # --- One dense fused (experts + gate) matmul per input source, f32 accumulation.
    ys = []
    for s in range(Gin):                                        # static unroll (Gin tiny)
        y = jnp.dot(xs_ref[s], w_ref[s], preferred_element_type=jnp.float32)
        ys.append(y + b_ref[s])                                 # (Bt, C) f32

    # --- Expert activations, packed lane-contiguously in global-expert order.
    chunks = []
    for s in range(Gin):
        n_exp_s = n_spec if s < domain_num else n_shared
        chunks.append(jnp.maximum(ys[s][:, :n_exp_s * H], 0.0))  # ReLU, (Bt, n_exp_s*H)
    y_packed = jnp.concatenate(chunks, axis=1)                   # (Bt, E*H)
    # TODO(synk): at production sizes (per-source widths multiples of 128 lanes) this
    # concat is a cheap lane-aligned copy; at toy size it relayouts 32-lane chunks once.

    rexp = rexp_ref[...]                                         # (E, E*H)

    gate_srcs = list(range(domain_num)) + ([domain_num] if G > domain_num else [])
    for g, s in enumerate(gate_srcs):                            # static unroll (G tiny)
        # Masked softmax over the E gate columns of source s.  Masked lanes carry a
        # -1e30 bias folded in at pack time, so exp() underflows to exactly 0 and the
        # masked softmax equals the subset softmax (every gate has >=1 unmasked expert).
        lg = ys[s][:, EXP_W:EXP_W + E]                           # (Bt, E) logits
        lg = lg - jnp.max(lg, axis=-1, keepdims=True)
        p = jnp.exp(lg)
        ssum = jnp.sum(p, axis=-1, keepdims=True)                # (Bt, 1)
        inv = pl.reciprocal(ssum, approx=True)                   # EUP, not a VALU divide
        inv = inv * (2.0 - ssum * inv)                           # one Newton step -> ~f32 accuracy
        probs = p * inv                                          # (Bt, E)

        # Lane-expand the E gate weights across H lanes on the MXU (no single-lane
        # extract broadcasts), then one full-width multiply + E-1 chunk adds.
        gexp = jnp.dot(probs, rexp, preferred_element_type=jnp.float32)   # (Bt, E*H)
        prod = gexp * y_packed                                   # full-width VALU multiply
        acc = prod[:, 0:H]
        for e in range(1, E):                                    # static unroll (E tiny)
            acc = acc + prod[:, e * H:(e + 1) * H]
        o_ref[:, g * H:(g + 1) * H] = acc                        # direct slice store

    if OUT_PAD > G * H:                                          # zero the lane padding once
        o_ref[:, G * H:] = jnp.zeros((o_ref.shape[0], OUT_PAD - G * H), jnp.float32)


# --------------------------- host-side weight pack -------------------------- #

def build_cgc_params(key, domain_num, n_spec, n_shared, input_dim, hidden_dim):
    """Deterministic parameter init (synthetic; stands in for nn.Linear init)."""
    E = domain_num * n_spec + n_shared
    K = n_spec + n_shared
    ks = jax.random.split(key, 6)
    s = 1.0 / math.sqrt(input_dim)
    return dict(
        we=jax.random.uniform(ks[0], (E, input_dim, hidden_dim), jnp.float32, -s, s),
        be=jax.random.uniform(ks[1], (E, hidden_dim), jnp.float32, -s, s),
        wg=jax.random.uniform(ks[2], (domain_num, input_dim, K), jnp.float32, -s, s),
        bg=jax.random.uniform(ks[3], (domain_num, K), jnp.float32, -s, s),
        wgs=jax.random.uniform(ks[4], (input_dim, E), jnp.float32, -s, s),
        bgs=jax.random.uniform(ks[5], (E,), jnp.float32, -s, s),
    )


def pack_cgc_weights(params, *, domain_num, n_spec, n_shared, input_dim, hidden_dim,
                     has_shared_gate):
    """One-time host-side constant fold + per-source dense packing.

    Per-source column layout (width C = round_up(max_experts*H + E, 128)):
      cols [0, n_exp_s*H)       : this source's expert Linears (BN scale folded)
      cols [EXP_W, EXP_W + E)   : this source's gate Linear, scattered into global
                                  expert-index space; masked lanes get zero weights
                                  and a -1e30 bias (mask folded into the bias)
      remaining cols            : zero padding (never read)
    Weights are returned in bfloat16 (MXU operands), biases in f32.
    """
    D, H = input_dim, hidden_dim
    E = domain_num * n_spec + n_shared
    Gin = domain_num + 1
    EXP_W = max(n_spec, n_shared) * H
    C = _round_up(EXP_W + E, 128)

    we = np.asarray(params["we"], np.float32) * BN_SCALE          # (E, D, H)
    be = np.asarray(params["be"], np.float32) * BN_SCALE          # (E, H)
    wg = np.asarray(params["wg"], np.float32) * BN_SCALE          # (domain_num, D, K)
    bg = np.asarray(params["bg"], np.float32) * BN_SCALE          # (domain_num, K)

    W = np.zeros((Gin, D, C), np.float32)
    b = np.zeros((Gin, 1, C), np.float32)

    for e in range(E):
        if e < domain_num * n_spec:
            s, e_loc = e // n_spec, e % n_spec
        else:
            s, e_loc = domain_num, e - domain_num * n_spec
        W[s, :, e_loc * H:(e_loc + 1) * H] = we[e]
        b[s, 0, e_loc * H:(e_loc + 1) * H] = be[e]

    for i in range(domain_num):
        b[i, 0, EXP_W:EXP_W + E] = NEG_MASK                       # default: masked
        cols = list(range(i * n_spec, (i + 1) * n_spec)) + \
               list(range(domain_num * n_spec, E))
        for j, c in enumerate(cols):
            W[i, :, EXP_W + c] = wg[i, :, j]
            b[i, 0, EXP_W + c] = bg[i, j]
    if has_shared_gate:
        W[domain_num, :, EXP_W:EXP_W + E] = np.asarray(params["wgs"], np.float32) * BN_SCALE
        b[domain_num, 0, EXP_W:EXP_W + E] = np.asarray(params["bgs"], np.float32) * BN_SCALE

    # Constant 0/1 lane-expansion matrix: (Bt, E) @ (E, E*H) broadcasts gate weight e
    # across its expert's H lanes on the MXU.
    R = np.zeros((E, E * H), np.float32)
    for e in range(E):
        R[e, e * H:(e + 1) * H] = 1.0

    return (jnp.asarray(W, jnp.bfloat16),        # bf16 MXU operands
            jnp.asarray(b, jnp.float32),
            jnp.asarray(R, jnp.float32))


# ------------------------------ JAX wrapper -------------------------------- #

def _pick_block_b(B):
    # Prefer >=2 sublane-aligned batch tiles so v7x's 2 TensorCores both get work on
    # the "parallel" axis; cap the tile at 512 rows (raise toward 1024 on v6e at
    # production B to amortize the ~0.35us per-grid-step overhead).
    for c in (512, 256, 128, 64, 32, 16, 8):
        if B % c == 0 and B // c >= 2:
            return c
    return B


def cgc_forward(xs, packed, *, domain_num, n_spec, n_shared, cur_level, n_level,
                hidden_dim, block_b=None):
    """xs: stacked inputs (Gin, B, D) = [x_dom0, ..., x_dom{n-1}, x_shared].
    Returns a list of (B, H) outputs: one per domain (+1 shared if cur_level < n_level)."""
    W, b, R = packed
    Gin, B, D = xs.shape
    assert Gin == domain_num + 1
    H = hidden_dim
    E = domain_num * n_spec + n_shared
    has_shared_gate = cur_level < n_level
    G = domain_num + (1 if has_shared_gate else 0)
    EXP_W = max(n_spec, n_shared) * H
    C = W.shape[-1]
    OUT_PAD = _round_up(G * H, 128)                  # lane-dense (unmasked) output stores

    if block_b is None:
        block_b = _pick_block_b(B)
    assert B % block_b == 0  # TODO(synk): pad B / tail-mask for production batch sizes
    grid = (B // block_b,)

    xs_c = xs.astype(jnp.bfloat16)                   # matmul operands bf16, f32 accumulation

    kernel = functools.partial(
        _cgc_fused_kernel, domain_num=domain_num, n_spec=n_spec, n_shared=n_shared,
        H=H, E=E, G=G, EXP_W=EXP_W, OUT_PAD=OUT_PAD)

    out = pl.pallas_call(
        kernel,
        out_shape=jax.ShapeDtypeStruct((B, OUT_PAD), jnp.float32),
        grid=grid,
        in_specs=[
            pl.BlockSpec((Gin, block_b, D), lambda i: (0, i, 0)),   # x batch tile
            # Invariant (resident) operands; constant index_map => copied once.
            # TODO(synk): on v7x (64 MiB VMEM) add pipeline_mode=pl.Buffered(1) to these
            # three specs so the invariant weights/bias/R are not double-buffered.
            pl.BlockSpec((Gin, D, C), lambda i: (0, 0, 0)),         # packed per-source W (bf16)
            pl.BlockSpec((Gin, 1, C), lambda i: (0, 0, 0)),         # packed bias (+ mask fold)
            pl.BlockSpec((E, E * H), lambda i: (0, 0)),             # gate lane-expansion matrix
        ],
        out_specs=pl.BlockSpec((block_b, OUT_PAD), lambda i: (i, 0)),
        compiler_params=pltpu.CompilerParams(
            dimension_semantics=("parallel",),
            vmem_limit_bytes=32 * 1024 * 1024,       # explicit (v5e scoped default is 16 MiB)
        ),
    )(xs_c, W, b, R)

    return [out[:, g * H:(g + 1) * H] for g in range(G)]


# --------------------------- pure-JAX reference ----------------------------- #

def cgc_reference(x_list, params, *, domain_num, n_spec, n_shared, cur_level, n_level,
                  matmul_dtype=jnp.float32):
    """Reference CGC.  matmul_dtype=bfloat16 mirrors the kernel's declared matmul
    precision (BN scale folded into weights before the cast, f32 accumulation)."""
    def linear_bn(x, w, bb):
        if matmul_dtype == jnp.float32:
            return (jnp.dot(x, w) + bb) * BN_SCALE
        w_eff = (w * BN_SCALE).astype(matmul_dtype)
        return jnp.dot(x.astype(matmul_dtype), w_eff,
                       preferred_element_type=jnp.float32) + bb * BN_SCALE

    E = domain_num * n_spec + n_shared
    expert_outs = []
    for e in range(E):
        x = x_list[e // n_spec] if e < domain_num * n_spec else x_list[-1]
        expert_outs.append(jnp.maximum(linear_bn(x, params["we"][e], params["be"][e]), 0.0))
    outs = []
    for i in range(domain_num):
        gate = jax.nn.softmax(linear_bn(x_list[i], params["wg"][i], params["bg"][i]), axis=1)
        idx = list(range(i * n_spec, (i + 1) * n_spec)) + \
              list(range(domain_num * n_spec, E))
        stacked = jnp.stack([expert_outs[k] for k in idx], axis=1)          # (B, K, H)
        outs.append(jnp.sum(gate[:, :, None] * stacked, axis=1))
    if cur_level < n_level:
        gate = jax.nn.softmax(linear_bn(x_list[-1], params["wgs"], params["bgs"]), axis=1)
        stacked = jnp.stack(expert_outs, axis=1)                            # (B, E, H)
        outs.append(jnp.sum(gate[:, :, None] * stacked, axis=1))
    return outs


# ----------------------------------- main ----------------------------------- #

if __name__ == "__main__":
    # Small CGC configuration (shared-gate branch exercised).
    cur_level, n_level = 1, 2
    domain_num = 3
    n_expert_specific = 2
    n_expert_shared = 2
    B, D, H = 16, 32, 16         # batch, input_dims, expert_params["dims"][-1]
    # E = 8 experts, Gin = 4 input sources, G = 4 gates; per-source packed width C = 128,
    # packed output padded to 128 lanes; block_b = 8 -> grid=(2,) parallel batch tiles.

    key = jax.random.PRNGKey(0)
    k_par, k_x = jax.random.split(key)
    params = build_cgc_params(k_par, domain_num, n_expert_specific, n_expert_shared, D, H)

    has_shared_gate = cur_level < n_level
    packed = pack_cgc_weights(
        params, domain_num=domain_num, n_spec=n_expert_specific,
        n_shared=n_expert_shared, input_dim=D, hidden_dim=H,
        has_shared_gate=has_shared_gate)

    # Stacked inputs: one per domain + the shared input (domain_num + 1 tensors).
    xs = jax.random.normal(k_x, (domain_num + 1, B, D), jnp.float32)
    x_list = [xs[i] for i in range(domain_num + 1)]

    kw = dict(domain_num=domain_num, n_spec=n_expert_specific,
              n_shared=n_expert_shared, cur_level=cur_level, n_level=n_level)

    outs = cgc_forward(xs, packed, hidden_dim=H, **kw)
    outs = [jax.block_until_ready(o) for o in outs]

    n_out = domain_num + (1 if has_shared_gate else 0)
    assert len(outs) == n_out

    # Primary check: reference using the same declared matmul precision (bf16 operands,
    # f32 accumulation).  Remaining diffs: accumulation order + Newton-refined reciprocal.
    ref_bf16 = cgc_reference(x_list, params, matmul_dtype=jnp.bfloat16, **kw)
    # Sanity check vs. the pure-f32 reference (looser: bf16 operand rounding dominates).
    ref_f32 = cgc_reference(x_list, params, matmul_dtype=jnp.float32, **kw)
    for o, rb, rf in zip(outs, ref_bf16, ref_f32):
        assert o.shape == (B, H)
        np.testing.assert_allclose(np.asarray(o), np.asarray(rb), rtol=1e-3, atol=1e-3)
        np.testing.assert_allclose(np.asarray(o), np.asarray(rf), rtol=5e-2, atol=5e-2)

    print("KERNEL_OK")
</pallas_src>

<mosaic_0001>
module attributes {stable_mosaic.version = 11 : i64} {
  func.func @_cgc_fused_kernel(%arg0: i32, %arg1: memref<4x8x32xbf16, #tpu.memory_space<vmem>>, %arg2: memref<4x32x128xbf16, #tpu.memory_space<vmem>>, %arg3: memref<4x1x128xf32, #tpu.memory_space<vmem>>, %arg4: memref<8x128xf32, #tpu.memory_space<vmem>>, %arg5: memref<8x128xf32, #tpu.memory_space<vmem>>) attributes {dimension_semantics = [#tpu.dimension_semantics<parallel>], iteration_bounds = array<i64: 2>, scalar_prefetch = 0 : i64, scratch_operands = 0 : i64, tpu.core_type = #tpu.core_type<tc>, window_params = [{transform_indices = @transform_0, window_bounds = array<i64: 4, 8, 32>}, {pipeline_mode = #tpu.pipeline_mode<synchronous>, transform_indices = @transform_1, window_bounds = array<i64: 4, 32, 128>}, {pipeline_mode = #tpu.pipeline_mode<synchronous>, transform_indices = @transform_2, window_bounds = array<i64: 4, 1, 128>}, {pipeline_mode = #tpu.pipeline_mode<synchronous>, transform_indices = @transform_3, window_bounds = array<i64: 8, 128>}, {transform_indices = @transform_4, window_bounds = array<i64: 8, 128>}]} {
    %c0 = arith.constant 0 : index
    %c0_0 = arith.constant 0 : index
    %c0_1 = arith.constant 0 : index
    %0 = vector.load %arg1[%c0, %c0_0, %c0_1] : memref<4x8x32xbf16, #tpu.memory_space<vmem>>, vector<1x8x32xbf16>
    %1 = vector.shape_cast %0 : vector<1x8x32xbf16> to vector<8x32xbf16>
    %c0_2 = arith.constant 0 : index
    %c0_3 = arith.constant 0 : index
    %c0_4 = arith.constant 0 : index
    %2 = vector.load %arg2[%c0_2, %c0_3, %c0_4] : memref<4x32x128xbf16, #tpu.memory_space<vmem>>, vector<1x32x128xbf16>
    %3 = vector.shape_cast %2 : vector<1x32x128xbf16> to vector<32x128xbf16>
    %cst = arith.constant dense<0.000000e+00> : vector<8x128xf32>
    %4 = tpu.matmul %1, %3, %cst {dimension_numbers = #tpu.dot_dimension_numbers<[1], [0], [0], [1], [0, 0, 1, 1], [], []>} : vector<8x32xbf16>, vector<32x128xbf16>, vector<8x128xf32> -> vector<8x128xf32>
    %c0_5 = arith.constant 0 : index
    %c0_6 = arith.constant 0 : index
    %c0_7 = arith.constant 0 : index
    %5 = vector.load %arg3[%c0_5, %c0_6, %c0_7] : memref<4x1x128xf32, #tpu.memory_space<vmem>>, vector<1x1x128xf32>
    %6 = vector.shape_cast %5 : vector<1x1x128xf32> to vector<1x128xf32>
    %7 = vector.broadcast %6 : vector<1x128xf32> to vector<8x128xf32>
    %8 = arith.addf %4, %7 : vector<8x128xf32>
    %c1 = arith.constant 1 : index
    %c0_8 = arith.constant 0 : index
    %c0_9 = arith.constant 0 : index
    %9 = vector.load %arg1[%c1, %c0_8, %c0_9] : memref<4x8x32xbf16, #tpu.memory_space<vmem>>, vector<1x8x32xbf16>
    %10 = vector.shape_cast %9 : vector<1x8x32xbf16> to vector<8x32xbf16>
    %c1_10 = arith.constant 1 : index
    %c0_11 = arith.constant 0 : index
    %c0_12 = arith.constant 0 : index
    %11 = vector.load %arg2[%c1_10, %c0_11, %c0_12] : memref<4x32x128xbf16, #tpu.memory_space<vmem>>, vector<1x32x128xbf16>
    %12 = vector.shape_cast %11 : vector<1x32x128xbf16> to vector<32x128xbf16>
    %cst_13 = arith.constant dense<0.000000e+00> : vector<8x128xf32>
    %13 = tpu.matmul %10, %12, %cst_13 {dimension_numbers = #tpu.dot_dimension_numbers<[1], [0], [0], [1], [0, 0, 1, 1], [], []>} : vector<8x32xbf16>, vector<32x128xbf16>, vector<8x128xf32> -> vector<8x128xf32>
    %c1_14 = arith.constant 1 : index
    %c0_15 = arith.constant 0 : index
    %c0_16 = arith.constant 0 : index
    %14 = vector.load %arg3[%c1_14, %c0_15, %c0_16] : memref<4x1x128xf32, #tpu.memory_space<vmem>>, vector<1x1x128xf32>
    %15 = vector.shape_cast %14 : vector<1x1x128xf32> to vector<1x128xf32>
    %16 = vector.broadcast %15 : vector<1x128xf32> to vector<8x128xf32>
    %17 = arith.addf %13, %16 : vector<8x128xf32>
    %c2 = arith.constant 2 : index
    %c0_17 = arith.constant 0 : index
    %c0_18 = arith.constant 0 : index
    %18 = vector.load %arg1[%c2, %c0_17, %c0_18] : memref<4x8x32xbf16, #tpu.memory_space<vmem>>, vector<1x8x32xbf16>
    %19 = vector.shape_cast %18 : vector<1x8x32xbf16> to vector<8x32xbf16>
    %c2_19 = arith.constant 2 : index
    %c0_20 = arith.constant 0 : index
    %c0_21 = arith.constant 0 : index
    %20 = vector.load %arg2[%c2_19, %c0_20, %c0_21] : memref<4x32x128xbf16, #tpu.memory_space<vmem>>, vector<1x32x128xbf16>
    %21 = vector.shape_cast %20 : vector<1x32x128xbf16> to vector<32x128xbf16>
    %cst_22 = arith.constant dense<0.000000e+00> : vector<8x128xf32>
    %22 = tpu.matmul %19, %21, %cst_22 {dimension_numbers = #tpu.dot_dimension_numbers<[1], [0], [0], [1], [0, 0, 1, 1], [], []>} : vector<8x32xbf16>, vector<32x128xbf16>, vector<8x128xf32> -> vector<8x128xf32>
    %c2_23 = arith.constant 2 : index
    %c0_24 = arith.constant 0 : index
    %c0_25 = arith.constant 0 : index
    %23 = vector.load %arg3[%c2_23, %c0_24, %c0_25] : memref<4x1x128xf32, #tpu.memory_space<vmem>>, vector<1x1x128xf32>
    %24 = vector.shape_cast %23 : vector<1x1x128xf32> to vector<1x128xf32>
    %25 = vector.broadcast %24 : vector<1x128xf32> to vector<8x128xf32>
    %26 = arith.addf %22, %25 : vector<8x128xf32>
    %c3 = arith.constant 3 : index
    %c0_26 = arith.constant 0 : index
    %c0_27 = arith.constant 0 : index
    %27 = vector.load %arg1[%c3, %c0_26, %c0_27] : memref<4x8x32xbf16, #tpu.memory_space<vmem>>, vector<1x8x32xbf16>
    %28 = vector.shape_cast %27 : vector<1x8x32xbf16> to vector<8x32xbf16>
    %c3_28 = arith.constant 3 : index
    %c0_29 = arith.constant 0 : index
    %c0_30 = arith.constant 0 : index
    %29 = vector.load %arg2[%c3_28, %c0_29, %c0_30] : memref<4x32x128xbf16, #tpu.memory_space<vmem>>, vector<1x32x128xbf16>
    %30 = vector.shape_cast %29 : vector<1x32x128xbf16> to vector<32x128xbf16>
    %cst_31 = arith.constant dense<0.000000e+00> : vector<8x128xf32>
    %31 = tpu.matmul %28, %30, %cst_31 {dimension_numbers = #tpu.dot_dimension_numbers<[1], [0], [0], [1], [0, 0, 1, 1], [], []>} : vector<8x32xbf16>, vector<32x128xbf16>, vector<8x128xf32> -> vector<8x128xf32>
    %c3_32 = arith.constant 3 : index
    %c0_33 = arith.constant 0 : index
    %c0_34 = arith.constant 0 : index
    %32 = vector.load %arg3[%c3_32, %c0_33, %c0_34] : memref<4x1x128xf32, #tpu.memory_space<vmem>>, vector<1x1x128xf32>
    %33 = vector.shape_cast %32 : vector<1x1x128xf32> to vector<1x128xf32>
    %34 = vector.broadcast %33 : vector<1x128xf32> to vector<8x128xf32>
    %35 = arith.addf %31, %34 : vector<8x128xf32>
    %36 = vector.extract_strided_slice %8 {offsets = [0, 0], sizes = [8, 32], strides = [1, 1]} : vector<8x128xf32> to vector<8x32xf32>
    %cst_35 = arith.constant 0.000000e+00 : f32
    %37 = vector.broadcast %cst_35 : f32 to vector<8x32xf32>
    %38 = arith.maximumf %36, %37 : vector<8x32xf32>
    %39 = vector.extract_strided_slice %17 {offsets = [0, 0], sizes = [8, 32], strides = [1, 1]} : vector<8x128xf32> to vector<8x32xf32>
    %cst_36 = arith.constant 0.000000e+00 : f32
    %40 = vector.broadcast %cst_36 : f32 to vector<8x32xf32>
    %41 = arith.maximumf %39, %40 : vector<8x32xf32>
    %42 = vector.extract_strided_slice %26 {offsets = [0, 0], sizes = [8, 32], strides = [1, 1]} : vector<8x128xf32> to vector<8x32xf32>
    %cst_37 = arith.constant 0.000000e+00 : f32
    %43 = vector.broadcast %cst_37 : f32 to vector<8x32xf32>
    %44 = arith.maximumf %42, %43 : vector<8x32xf32>
    %45 = vector.extract_strided_slice %35 {offsets = [0, 0], sizes = [8, 32], strides = [1, 1]} : vector<8x128xf32> to vector<8x32xf32>
    %cst_38 = arith.constant 0.000000e+00 : f32
    %46 = vector.broadcast %cst_38 : f32 to vector<8x32xf32>
    %47 = arith.maximumf %45, %46 : vector<8x32xf32>
    %48 = tpu.concatenate %38, %41, %44, %47 in 1 : vector<8x32xf32>, vector<8x32xf32>, vector<8x32xf32>, vector<8x32xf32> -> vector<8x128xf32>
    %c0_39 = arith.constant 0 : index
    %c0_40 = arith.constant 0 : index
    %49 = vector.load %arg4[%c0_39, %c0_40] : memref<8x128xf32, #tpu.memory_space<vmem>>, vector<8x128xf32>
    %50 = vector.extract_strided_slice %8 {offsets = [0, 32], sizes = [8, 8], strides = [1, 1]} : vector<8x128xf32> to vector<8x8xf32>
    %cst_41 = arith.constant dense<0xFF800000> : vector<8xf32>
    %51 = vector.multi_reduction <maximumf>, %50, %cst_41 [1] : vector<8x8xf32> to vector<8xf32>
    %52 = vector.shape_cast %51 : vector<8xf32> to vector<8x1xf32>
    %53 = vector.broadcast %52 : vector<8x1xf32> to vector<8x8xf32>
    %54 = arith.subf %50, %53 : vector<8x8xf32>
    %55 = math.exp %54 : vector<8x8xf32>
    %cst_42 = arith.constant dense<0.000000e+00> : vector<8xf32>
    %56 = vector.multi_reduction <add>, %55, %cst_42 [1] : vector<8x8xf32> to vector<8xf32>
    %57 = vector.shape_cast %56 : vector<8xf32> to vector<8x1xf32>
    %58 = tpu.reciprocal %57 {approx = true} : vector<8x1xf32> -> vector<8x1xf32>
    %59 = arith.mulf %57, %58 : vector<8x1xf32>
    %cst_43 = arith.constant 2.000000e+00 : f32
    %60 = vector.broadcast %cst_43 : f32 to vector<8x1xf32>
    %61 = arith.subf %60, %59 : vector<8x1xf32>
    %62 = arith.mulf %58, %61 : vector<8x1xf32>
    %63 = vector.broadcast %62 : vector<8x1xf32> to vector<8x8xf32>
    %64 = arith.mulf %55, %63 : vector<8x8xf32>
    %cst_44 = arith.constant dense<0.000000e+00> : vector<8x128xf32>
    %65 = tpu.matmul %64, %49, %cst_44 {dimension_numbers = #tpu.dot_dimension_numbers<[1], [0], [0], [1], [0, 0, 1, 1], [], []>} : vector<8x8xf32>, vector<8x128xf32>, vector<8x128xf32> -> vector<8x128xf32>
    %66 = arith.mulf %65, %48 : vector<8x128xf32>
    %67 = vector.extract_strided_slice %66 {offsets = [0, 0], sizes = [8, 16], strides = [1, 1]} : vector<8x128xf32> to vector<8x16xf32>
    %68 = vector.extract_strided_slice %66 {offsets = [0, 16], sizes = [8, 16], strides = [1, 1]} : vector<8x128xf32> to vector<8x16xf32>
    %69 = arith.addf %67, %68 : vector<8x16xf32>
    %70 = vector.extract_strided_slice %66 {offsets = [0, 32], sizes = [8, 16], strides = [1, 1]} : vector<8x128xf32> to vector<8x16xf32>
    %71 = arith.addf %69, %70 : vector<8x16xf32>
    %72 = vector.extract_strided_slice %66 {offsets = [0, 48], sizes = [8, 16], strides = [1, 1]} : vector<8x128xf32> to vector<8x16xf32>
    %73 = arith.addf %71, %72 : vector<8x16xf32>
    %74 = vector.extract_strided_slice %66 {offsets = [0, 64], sizes = [8, 16], strides = [1, 1]} : vector<8x128xf32> to vector<8x16xf32>
    %75 = arith.addf %73, %74 : vector<8x16xf32>
    %76 = vector.extract_strided_slice %66 {offsets = [0, 80], sizes = [8, 16], strides = [1, 1]} : vector<8x128xf32> to vector<8x16xf32>
    %77 = arith.addf %75, %76 : vector<8x16xf32>
    %78 = vector.extract_strided_slice %66 {offsets = [0, 96], sizes = [8, 16], strides = [1, 1]} : vector<8x128xf32> to vector<8x16xf32>
    %79 = arith.addf %77, %78 : vector<8x16xf32>
    %80 = vector.extract_strided_slice %66 {offsets = [0, 112], sizes = [8, 16], strides = [1, 1]} : vector<8x128xf32> to vector<8x16xf32>
    %81 = arith.addf %79, %80 : vector<8x16xf32>
    %c0_45 = arith.constant 0 : index
    %c0_46 = arith.constant 0 : index
    %82 = vector.load %arg5[%c0_45, %c0_46] : memref<8x128xf32, #tpu.memory_space<vmem>>, vector<8x16xf32>
    tpu.vector_store %arg5[%c0_45, %c0_46], %81 {strides = array<i32>} : memref<8x128xf32, #tpu.memory_space<vmem>>, vector<8x16xf32>,
    %83 = vector.extract_strided_slice %17 {offsets = [0, 32], sizes = [8, 8], strides = [1, 1]} : vector<8x128xf32> to vector<8x8xf32>
    %cst_47 = arith.constant dense<0xFF800000> : vector<8xf32>
    %84 = vector.multi_reduction <maximumf>, %83, %cst_47 [1] : vector<8x8xf32> to vector<8xf32>
    %85 = vector.shape_cast %84 : vector<8xf32> to vector<8x1xf32>
    %86 = vector.broadcast %85 : vector<8x1xf32> to vector<8x8xf32>
    %87 = arith.subf %83, %86 : vector<8x8xf32>
    %88 = math.exp %87 : vector<8x8xf32>
    %cst_48 = arith.constant dense<0.000000e+00> : vector<8xf32>
    %89 = vector.multi_reduction <add>, %88, %cst_48 [1] : vector<8x8xf32> to vector<8xf32>
    %90 = vector.shape_cast %89 : vector<8xf32> to vector<8x1xf32>
    %91 = tpu.reciprocal %90 {approx = true} : vector<8x1xf32> -> vector<8x1xf32>
    %92 = arith.mulf %90, %91 : vector<8x1xf32>
    %cst_49 = arith.constant 2.000000e+00 : f32
    %93 = vector.broadcast %cst_49 : f32 to vector<8x1xf32>
    %94 = arith.subf %93, %92 : vector<8x1xf32>
    %95 = arith.mulf %91, %94 : vector<8x1xf32>
    %96 = vector.broadcast %95 : vector<8x1xf32> to vector<8x8xf32>
    %97 = arith.mulf %88, %96 : vector<8x8xf32>
    %cst_50 = arith.constant dense<0.000000e+00> : vector<8x128xf32>
    %98 = tpu.matmul %97, %49, %cst_50 {dimension_numbers = #tpu.dot_dimension_numbers<[1], [0], [0], [1], [0, 0, 1, 1], [], []>} : vector<8x8xf32>, vector<8x128xf32>, vector<8x128xf32> -> vector<8x128xf32>
    %99 = arith.mulf %98, %48 : vector<8x128xf32>
    %100 = vector.extract_strided_slice %99 {offsets = [0, 0], sizes = [8, 16], strides = [1, 1]} : vector<8x128xf32> to vector<8x16xf32>
    %101 = vector.extract_strided_slice %99 {offsets = [0, 16], sizes = [8, 16], strides = [1, 1]} : vector<8x128xf32> to vector<8x16xf32>
    %102 = arith.addf %100, %101 : vector<8x16xf32>
    %103 = vector.extract_strided_slice %99 {offsets = [0, 32], sizes = [8, 16], strides = [1, 1]} : vector<8x128xf32> to vector<8x16xf32>
    %104 = arith.addf %102, %103 : vector<8x16xf32>
    %105 = vector.extract_strided_slice %99 {offsets = [0, 48], sizes = [8, 16], strides = [1, 1]} : vector<8x128xf32> to vector<8x16xf32>
    %106 = arith.addf %104, %105 : vector<8x16xf32>
    %107 = vector.extract_strided_slice %99 {offsets = [0, 64], sizes = [8, 16], strides = [1, 1]} : vector<8x128xf32> to vector<8x16xf32>
    %108 = arith.addf %106, %107 : vector<8x16xf32>
    %109 = vector.extract_strided_slice %99 {offsets = [0, 80], sizes = [8, 16], strides = [1, 1]} : vector<8x128xf32> to vector<8x16xf32>
    %110 = arith.addf %108, %109 : vector<8x16xf32>
    %111 = vector.extract_strided_slice %99 {offsets = [0, 96], sizes = [8, 16], strides = [1, 1]} : vector<8x128xf32> to vector<8x16xf32>
    %112 = arith.addf %110, %111 : vector<8x16xf32>
    %113 = vector.extract_strided_slice %99 {offsets = [0, 112], sizes = [8, 16], strides = [1, 1]} : vector<8x128xf32> to vector<8x16xf32>
    %114 = arith.addf %112, %113 : vector<8x16xf32>
    %c0_51 = arith.constant 0 : index
    %c16 = arith.constant 16 : index
    %115 = vector.load %arg5[%c0_51, %c16] : memref<8x128xf32, #tpu.memory_space<vmem>>, vector<8x16xf32>
    tpu.vector_store %arg5[%c0_51, %c16], %114 {strides = array<i32>} : memref<8x128xf32, #tpu.memory_space<vmem>>, vector<8x16xf32>,
    %116 = vector.extract_strided_slice %26 {offsets = [0, 32], sizes = [8, 8], strides = [1, 1]} : vector<8x128xf32> to vector<8x8xf32>
    %cst_52 = arith.constant dense<0xFF800000> : vector<8xf32>
    %117 = vector.multi_reduction <maximumf>, %116, %cst_52 [1] : vector<8x8xf32> to vector<8xf32>
    %118 = vector.shape_cast %117 : vector<8xf32> to vector<8x1xf32>
    %119 = vector.broadcast %118 : vector<8x1xf32> to vector<8x8xf32>
    %120 = arith.subf %116, %119 : vector<8x8xf32>
    %121 = math.exp %120 : vector<8x8xf32>
    %cst_53 = arith.constant dense<0.000000e+00> : vector<8xf32>
    %122 = vector.multi_reduction <add>, %121, %cst_53 [1] : vector<8x8xf32> to vector<8xf32>
    %123 = vector.shape_cast %122 : vector<8xf32> to vector<8x1xf32>
    %124 = tpu.reciprocal %123 {approx = true} : vector<8x1xf32> -> vector<8x1xf32>
    %125 = arith.mulf %123, %124 : vector<8x1xf32>
    %cst_54 = arith.constant 2.000000e+00 : f32
    %126 = vector.broadcast %cst_54 : f32 to vector<8x1xf32>
    %127 = arith.subf %126, %125 : vector<8x1xf32>
    %128 = arith.mulf %124, %127 : vector<8x1xf32>
    %129 = vector.broadcast %128 : vector<8x1xf32> to vector<8x8xf32>
    %130 = arith.mulf %121, %129 : vector<8x8xf32>
    %cst_55 = arith.constant dense<0.000000e+00> : vector<8x128xf32>
    %131 = tpu.matmul %130, %49, %cst_55 {dimension_numbers = #tpu.dot_dimension_numbers<[1], [0], [0], [1], [0, 0, 1, 1], [], []>} : vector<8x8xf32>, vector<8x128xf32>, vector<8x128xf32> -> vector<8x128xf32>
    %132 = arith.mulf %131, %48 : vector<8x128xf32>
    %133 = vector.extract_strided_slice %132 {offsets = [0, 0], sizes = [8, 16], strides = [1, 1]} : vector<8x128xf32> to vector<8x16xf32>
    %134 = vector.extract_strided_slice %132 {offsets = [0, 16], sizes = [8, 16], strides = [1, 1]} : vector<8x128xf32> to vector<8x16xf32>
    %135 = arith.addf %133, %134 : vector<8x16xf32>
    %136 = vector.extract_strided_slice %132 {offsets = [0, 32], sizes = [8, 16], strides = [1, 1]} : vector<8x128xf32> to vector<8x16xf32>
    %137 = arith.addf %135, %136 : vector<8x16xf32>
    %138 = vector.extract_strided_slice %132 {offsets = [0, 48], sizes = [8, 16], strides = [1, 1]} : vector<8x128xf32> to vector<8x16xf32>
    %139 = arith.addf %137, %138 : vector<8x16xf32>
    %140 = vector.extract_strided_slice %132 {offsets = [0, 64], sizes = [8, 16], strides = [1, 1]} : vector<8x128xf32> to vector<8x16xf32>
    %141 = arith.addf %139, %140 : vector<8x16xf32>
    %142 = vector.extract_strided_slice %132 {offsets = [0, 80], sizes = [8, 16], strides = [1, 1]} : vector<8x128xf32> to vector<8x16xf32>
    %143 = arith.addf %141, %142 : vector<8x16xf32>
    %144 = vector.extract_strided_slice %132 {offsets = [0, 96], sizes = [8, 16], strides = [1, 1]} : vector<8x128xf32> to vector<8x16xf32>
    %145 = arith.addf %143, %144 : vector<8x16xf32>
    %146 = vector.extract_strided_slice %132 {offsets = [0, 112], sizes = [8, 16], strides = [1, 1]} : vector<8x128xf32> to vector<8x16xf32>
    %147 = arith.addf %145, %146 : vector<8x16xf32>
    %c0_56 = arith.constant 0 : index
    %c32 = arith.constant 32 : index
    %148 = vector.load %arg5[%c0_56, %c32] : memref<8x128xf32, #tpu.memory_space<vmem>>, vector<8x16xf32>
    tpu.vector_store %arg5[%c0_56, %c32], %147 {strides = array<i32>} : memref<8x128xf32, #tpu.memory_space<vmem>>, vector<8x16xf32>,
    %149 = vector.extract_strided_slice %35 {offsets = [0, 32], sizes = [8, 8], strides = [1, 1]} : vector<8x128xf32> to vector<8x8xf32>
    %cst_57 = arith.constant dense<0xFF800000> : vector<8xf32>
    %150 = vector.multi_reduction <maximumf>, %149, %cst_57 [1] : vector<8x8xf32> to vector<8xf32>
    %151 = vector.shape_cast %150 : vector<8xf32> to vector<8x1xf32>
    %152 = vector.broadcast %151 : vector<8x1xf32> to vector<8x8xf32>
    %153 = arith.subf %149, %152 : vector<8x8xf32>
    %154 = math.exp %153 : vector<8x8xf32>
    %cst_58 = arith.constant dense<0.000000e+00> : vector<8xf32>
    %155 = vector.multi_reduction <add>, %154, %cst_58 [1] : vector<8x8xf32> to vector<8xf32>
    %156 = vector.shape_cast %155 : vector<8xf32> to vector<8x1xf32>
    %157 = tpu.reciprocal %156 {approx = true} : vector<8x1xf32> -> vector<8x1xf32>
    %158 = arith.mulf %156, %157 : vector<8x1xf32>
    %cst_59 = arith.constant 2.000000e+00 : f32
    %159 = vector.broadcast %cst_59 : f32 to vector<8x1xf32>
    %160 = arith.subf %159, %158 : vector<8x1xf32>
    %161 = arith.mulf %157, %160 : vector<8x1xf32>
    %162 = vector.broadcast %161 : vector<8x1xf32> to vector<8x8xf32>
    %163 = arith.mulf %154, %162 : vector<8x8xf32>
    %cst_60 = arith.constant dense<0.000000e+00> : vector<8x128xf32>
    %164 = tpu.matmul %163, %49, %cst_60 {dimension_numbers = #tpu.dot_dimension_numbers<[1], [0], [0], [1], [0, 0, 1, 1], [], []>} : vector<8x8xf32>, vector<8x128xf32>, vector<8x128xf32> -> vector<8x128xf32>
    %165 = arith.mulf %164, %48 : vector<8x128xf32>
    %166 = vector.extract_strided_slice %165 {offsets = [0, 0], sizes = [8, 16], strides = [1, 1]} : vector<8x128xf32> to vector<8x16xf32>
    %167 = vector.extract_strided_slice %165 {offsets = [0, 16], sizes = [8, 16], strides = [1, 1]} : vector<8x128xf32> to vector<8x16xf32>
    %168 = arith.addf %166, %167 : vector<8x16xf32>
    %169 = vector.extract_strided_slice %165 {offsets = [0, 32], sizes = [8, 16], strides = [1, 1]} : vector<8x128xf32> to vector<8x16xf32>
    %170 = arith.addf %168, %169 : vector<8x16xf32>
    %171 = vector.extract_strided_slice %165 {offsets = [0, 48], sizes = [8, 16], strides = [1, 1]} : vector<8x128xf32> to vector<8x16xf32>
    %172 = arith.addf %170, %171 : vector<8x16xf32>
    %173 = vector.extract_strided_slice %165 {offsets = [0, 64], sizes = [8, 16], strides = [1, 1]} : vector<8x128xf32> to vector<8x16xf32>
    %174 = arith.addf %172, %173 : vector<8x16xf32>
    %175 = vector.extract_strided_slice %165 {offsets = [0, 80], sizes = [8, 16], strides = [1, 1]} : vector<8x128xf32> to vector<8x16xf32>
    %176 = arith.addf %174, %175 : vector<8x16xf32>
    %177 = vector.extract_strided_slice %165 {offsets = [0, 96], sizes = [8, 16], strides = [1, 1]} : vector<8x128xf32> to vector<8x16xf32>
    %178 = arith.addf %176, %177 : vector<8x16xf32>
    %179 = vector.extract_strided_slice %165 {offsets = [0, 112], sizes = [8, 16], strides = [1, 1]} : vector<8x128xf32> to vector<8x16xf32>
    %180 = arith.addf %178, %179 : vector<8x16xf32>
    %c0_61 = arith.constant 0 : index
    %c48 = arith.constant 48 : index
    %181 = vector.load %arg5[%c0_61, %c48] : memref<8x128xf32, #tpu.memory_space<vmem>>, vector<8x16xf32>
    tpu.vector_store %arg5[%c0_61, %c48], %180 {strides = array<i32>} : memref<8x128xf32, #tpu.memory_space<vmem>>, vector<8x16xf32>,
    %cst_62 = arith.constant 0.000000e+00 : f32
    %182 = vector.broadcast %cst_62 : f32 to vector<8x64xf32>
    %c0_63 = arith.constant 0 : index
    %c64 = arith.constant 64 : index
    %183 = vector.load %arg5[%c0_63, %c64] : memref<8x128xf32, #tpu.memory_space<vmem>>, vector<8x64xf32>
    tpu.vector_store %arg5[%c0_63, %c64], %182 {strides = array<i32>} : memref<8x128xf32, #tpu.memory_space<vmem>>, vector<8x64xf32>,
    return
  }
  func.func @transform_0(%arg0: i32) -> (i32, i32, i32) {
    %c0_i32 = arith.constant 0 : i32
    %c0_i32_0 = arith.constant 0 : i32
    %c0_i32_1 = arith.constant 0 : i32
    return %c0_i32, %arg0, %c0_i32_0 : i32, i32, i32
  }
  func.func @transform_1(%arg0: i32) -> (i32, i32, i32) {
    %c0_i32 = arith.constant 0 : i32
    %c0_i32_0 = arith.constant 0 : i32
    %c0_i32_1 = arith.constant 0 : i32
    %c0_i32_2 = arith.constant 0 : i32
    return %c0_i32, %c0_i32_0, %c0_i32_1 : i32, i32, i32
  }
  func.func @transform_2(%arg0: i32) -> (i32, i32, i32) {
    %c0_i32 = arith.constant 0 : i32
    %c0_i32_0 = arith.constant 0 : i32
    %c0_i32_1 = arith.constant 0 : i32
    %c0_i32_2 = arith.constant 0 : i32
    return %c0_i32, %c0_i32_0, %c0_i32_1 : i32, i32, i32
  }
  func.func @transform_3(%arg0: i32) -> (i32, i32) {
    %c0_i32 = arith.constant 0 : i32
    %c0_i32_0 = arith.constant 0 : i32
    %c0_i32_1 = arith.constant 0 : i32
    return %c0_i32, %c0_i32_0 : i32, i32
  }
  func.func @transform_4(%arg0: i32) -> (i32, i32) {
    %c0_i32 = arith.constant 0 : i32
    %c0_i32_0 = arith.constant 0 : i32
    return %arg0, %c0_i32 : i32, i32
  }
}

</mosaic_0001>

<bundles_post_ra>
// kernel: tpu_custom_call.1
= control target key start
LH: loop header
LB: loop body
LE: loop exit
PB: predicated region body
PF: predicated region fallthrough
CT: control target
= control target key end

     0   :  { %s1936_s0 = inlined_call_operand.hbm [shape: bf16[4,16,32], index: 0, kind: input, shape index: {}]   ;;  %s1937_s1 = inlined_call_operand.hbm [shape: bf16[4,32,128], index: 1, kind: input, shape index: {}]   ;;  %s1938_s2 = inlined_call_operand.hbm [shape: f32[4,1,128], index: 2, kind: input, shape index: {}]   ;;  %s1939_s3 = inlined_call_operand.vmem [shape: f32[8,128], index: 3, kind: input, shape index: {}]   ;;  %s1940_s4 = inlined_call_operand.hbm [shape: f32[16,128], index: 4, kind: output, shape index: {}]  }
   0x1   :  { %1948 = sst [smem:[#allocation12_spill]] %s1937_s1 }
   0x2   :  { %9 = vsyncpa [#allocation3], 0 }
   0x3   :  { %11 = vsyncpa [#allocation3 + $0x1], 0 }
   0x4   :  { %12 = vsyncpa [#allocation6], 0 }
   0x5   :  { %13 = vsyncpa [#allocation4], 0 }
   0x6   :  { %15 = vsyncpa [#allocation4 + $0x1], 0  ;;  %s1581_s15 = smov 0   ;;  %s1583_s16 = smov 0  }
   0x7   :  { %s1585_s17 = smov 0   ;;  %s1587_s18 = smov 0  }
   0x8 LB: > { %s1602_s19 = sadd.s32 4294967295, %s1536_s18   ;;  %s1164_s20 = sadd.s32 4294967294, %s1536_s18   ;;  %s1536_s18 = sphi %s1587_s18, %s1972_s18   ;;  %s1532_s17 = sphi %s1585_s17, %s1971_s17   ;;  %s1528_s16 = sphi %s1583_s16, %s1970_s16   ;;  %s1524_s15 = sphi %s1581_s15, %s1969_s15  }
   0x9   : > { %s1606_s21 = sadd.s32 1, %s1536_s18   ;;  %s28_s22 = sadd.s32 1, %s1532_s17 }
   0xa   : > { %s25_s23 = ssub.s32 %s1536_s18, %s1606_s21  ;;  %p35_p0 = scmp.ne.s32.totalorder %s1532_s17, %s1528_s16 }
   0xb   : > { %p26_p1 = scmp.eq.s32.totalorder %s25_s23, 0  ;;  %p36_p2 = scmp.eq.s32.totalorder %s1536_s18, 0 }
   0xc   : > { %p41_p3 = scmp.ne.s32.totalorder %s1528_s16, %s1524_s15  ;;  %p1941_p4 = scmp.eq.s32.totalorder %s1602_s19, 0 }
   0xd   : > { %s1618_s24 = scalar_select %p26_p1, %s1532_s17, %s28_s22  }
   0xe   : > { %p1620_p5 = por %p36_p2, %p35_p0  ;;  %p1626_p6 = por %p1941_p4, %p41_p3 }
   0xf   : > { %p128_p7 = scmp.eq.s32.totalorder %s1602_s19, 1  ;;  %p134_p8 = scmp.eq.s32.totalorder %s1164_s20, 1 }
  0x10   : > { %s1949_s25 = scalar_select %p1620_p5, 1, 0 }
  0x11   : > { %s1950_s26 = scalar_select %p1626_p6, 1, 0 }
  0x12   : > { %p1165_p9 = scmp.ge.s32.totalorder %s1536_s18, 1  ;;  %p141_p10 = scmp.lt.s32.totalorder %s1536_s18, 3 }
  0x13   : > { %p1633_p11 = por %p128_p7, %p35_p0  ;;  %p1637_p12 = por %p134_p8, %p41_p3 }
  0x14   : > { %p1641_p13 = pnand %p1165_p9, %p141_p10  ;;  %s1538_s30 = smov [#allocation5]  }
  0x15   : > { %s1951_s27 = scalar_select %p1633_p11, 1, 0 }
  0x16   : > { %s1952_s28 = scalar_select %p1637_p12, 1, 0 }
  0x17   : > { %s1953_s29 = scalar_select %p1641_p13, 1, 0 }
  0x18   : > { %p1287_p1 = pneg %p1641_p13  ;;  %s153_s5 = sshll.u32 %s1538_s30, 4  ;;  %s154_s5 = int_to_ptr.vmem [resolvable:$true] %s153_s5 }
  0x19   : > { %s1539_s7 = smov [#allocation7]   ;;  %s1955_s1 = sld [smem:[#allocation12_spill]] }
  0x1a   : > { %p1649_p2 = pnand %p1287_p1, %p1941_p4  ;;  %s166_s8 = sshll.u32 %s1539_s7, 4  ;;  %s167_s8 = int_to_ptr.vmem [resolvable:$true] %s166_s8 }
  0x1c   : > { %p1382_p8 = pneg %p1649_p2 }
  0x1f   : > { %s1380_s11 = scalar_lea.hbm %s1955_s1, 1024 }
  0x20   : > { %p1381_p7 = scmp.ne.s32.totalorder %s1955_s1, %s1380_s11  ;;  %p1387_p1 = scmp.lt.u32.totalorder %s1380_s11, %s1955_s1 }
  0x22   : > { %p1383_p9 = pnand %p1382_p8, %p1381_p7 }
  0x24   : > { %p1384_p10 = pneg %p1383_p9 }
  0x26   : > { %p1389_p0 = pnand %p1387_p1, %p1384_p10 }
  0x28   : > { %1392 = shalt.err (!%p1389_p0)
}
  0x29   : > { %s1393_s22 = scalar_lea.vmem %s154_s5, 1024  ;;  %p1401_p11 = scmp.lt.s32.totalorder %s154_s5, %s154_s5 }
  0x2a   : > { %p1394_p4 = scmp.ne.s32.totalorder %s154_s5, %s1393_s22  ;;  %p1402_p6 = scmp.lt.s32.totalorder %s1393_s22, %s1393_s22 }
  0x2c   : > { %p1396_p3 = pnand %p1394_p4, %p1382_p8  ;;  %p1403_p13 = por %p1402_p6, %p1401_p11 }
  0x2e   : > { %p1397_p12 = pneg %p1396_p3 }
  0x30   : > { %p1404_p5 = pnand %p1403_p13, %p1397_p12 }
  0x32   : > { %1407 = shalt.err (!%p1404_p5)
}
  0x33   : > { %s1946_s23 = smov 64   ;;  %s1947_s30 = smov 4  }
  0x34   : > { %1290 = dma.hbm_to_vmem [thread:$0]  (!%p1649_p2), %s1955_s1, 1024, %s154_s5, [#allocation6], %s1946_s23, %s1946_s23, %s1947_s30  }
  0x35   : > { %p1956_p4 = scmp.ne.s32.totalorder %s1949_s25, 0  ;;  %p1957_p0 = scmp.lt.s32.totalorder %s1536_s18, 2 }
  0x36   : > { %s183_s11 = sand.u32 1, %s1532_s17   ;;  %s1408_s14 = scalar_lea.hbm %s1938_s2, 64 }
  0x37   : > { %p1684_p6 = pnand %p1957_p0, %p1956_p4  ;;  %p1409_p5 = scmp.ne.s32.totalorder %s1938_s2, %s1408_s14 }
  0x38   : > { %p1415_p13 = scmp.lt.u32.totalorder %s1408_s14, %s1938_s2 }
  0x39   : > { %s1958_s10 = scalar_select %p1684_p6, 1, 0 }
  0x3a   : > { %p1411_p11 = pnand %p1409_p5, %p1382_p8 }
  0x3c   : > { %p1412_p12 = pneg %p1411_p11 }
  0x3e   : > { %p1417_p3 = pnand %p1415_p13, %p1412_p12 }
  0x40   : > { %1420 = shalt.err (!%p1417_p3)
}
  0x41   : > { %s1421_s7 = scalar_lea.vmem %s167_s8, 64  ;;  %p1429_p1 = scmp.lt.s32.totalorder %s167_s8, %s167_s8 }
  0x42   : > { %p1422_p7 = scmp.ne.s32.totalorder %s167_s8, %s1421_s7  ;;  %p1430_p4 = scmp.lt.s32.totalorder %s1421_s7, %s1421_s7 }
  0x44   : > { %p1424_p9 = pnand %p1422_p7, %p1382_p8  ;;  %p1431_p0 = por %p1430_p4, %p1429_p1 }
  0x46   : > { %p1425_p10 = pneg %p1424_p9 }
  0x48   : > { %p1432_p6 = pnand %p1431_p0, %p1425_p10 }
  0x4a   : > { %1435 = shalt.err (!%p1432_p6)
}
  0x4b   : > { %s1542_s9 = smov 16   ;;  %s1543_s12 = smov 1  }
  0x4c   : > { %1293 = dma.hbm_to_vmem [thread:$0]  (!%p1649_p2), %s1938_s2, 64, %s167_s8, [#allocation6], %s1542_s9, %s1542_s9, %s1543_s12  }
  0x4d   : > { %s1169_s20 = sshll.u32 %s183_s11, 4  ;;  %s1170_s22 = sshll.u32 %s1536_s18, 6 }
  0x4e   : > { %s1713_s7 = scalar_lea.hbm %s1936_s0, %s1170_s22  ;;  %s187_s23 = scalar_lea.vmem [#allocation2], %s1169_s20 }
  0x4f   : > { %s193_s30 = sshll.u32 %s187_s23, 4  ;;  %s1717_s6 = scalar_lea.sflag [#allocation3], %s183_s11  ;;  %s1715_s30 = int_to_ptr.vmem [resolvable:$true] %s193_s30 }
  0x50   : > { %s1436_s1 = scalar_lea.hbm %s1713_s7, 256  ;;  %p1959_p2 = scmp.ne.s32.totalorder %s1958_s10, 0 }
  0x51   : > { %p1437_p8 = scmp.ne.s32.totalorder %s1713_s7, %s1436_s1  ;;  %s1441_s12 = scalar_lea.hbm %s1936_s0, 512 }
  0x52   : > { %p1438_p6 = pneg %p1959_p2  ;;  %p1442_p12 = scmp.lt.u32.totalorder %s1713_s7, %s1936_s0 }
  0x53   : > { %p1443_p13 = scmp.lt.u32.totalorder %s1441_s12, %s1436_s1  ;;  %p1445_p7 = scmp.lt.u32.totalorder %s1436_s1, %s1713_s7 }
  0x54   : > { %p1439_p5 = pnand %p1438_p6, %p1437_p8 }
  0x55   : > { %p1444_p3 = por %p1443_p13, %p1442_p12 }
  0x56   : > { %p1440_p11 = pneg %p1439_p5 }
  0x57   : > { %p1446_p9 = por %p1445_p7, %p1444_p3 }
  0x59   : > { %p1447_p10 = pnand %p1446_p9, %p1440_p11 }
  0x5b   : > { %1450 = shalt.err (!%p1447_p10)
}
  0x5c   : > { %s1451_s23 = scalar_lea.vmem %s1715_s30, 256  ;;  %s1544_s11 = smov [#allocation2]  }
  0x5d   : > { %p1452_p1 = scmp.ne.s32.totalorder %s1715_s30, %s1451_s23  ;;  %s1456_s20 = sshll.u32 %s1544_s11, 4  ;;  %s1457_s20 = int_to_ptr.vmem [resolvable:$false] %s1456_s20 }
  0x5e   : > { %s1458_s22 = scalar_lea.vmem %s1457_s20, 512  ;;  %p1459_p8 = scmp.lt.s32.totalorder %s1715_s30, %s1457_s20 }
  0x5f   : > { %p1454_p4 = pnand %p1452_p1, %p1438_p6  ;;  %p1460_p5 = scmp.lt.s32.totalorder %s1458_s22, %s1451_s23 }
  0x61   : > { %p1455_p0 = pneg %p1454_p4  ;;  %p1461_p12 = por %p1460_p5, %p1459_p8 }
  0x63   : > { %p1462_p13 = pnand %p1461_p12, %p1455_p0 }
  0x65   : > { %1465 = shalt.err (!%p1462_p13)
}
  0x66   : > { %s1545_s1 = smov 128   ;;  %s1960_s25 = smov 4  }
  0x67   : > { %s1961_s5 = smov 64   ;;  %p1962_p6 = scmp.ne.s32.totalorder %s1953_s29, 0 }
  0x68   : > { %1297 = dma.hbm_to_vmem [thread:$0]  (!%p1959_p2), %s1713_s7, 256, %s1715_s30, %s1717_s6, %s1545_s1, %s1961_s5, %s1960_s25  }
  0x69   : > { %205 = sbr.rel (%p1962_p6) target bundleno = 1407 (0x57f), region = 36  ;;  %s1750_s8 = sand.u32 (!%p1962_p6), 1, %s1528_s16  }
  0x6a   : > { %s1172_s9 = sshll.u32 (!%p1962_p6), %s1750_s8, 4  ;;  %s208_s12 = scalar_lea.sflag (!%p1962_p6), [#allocation3], %s1750_s8 }
  0x6b   : > { %s1754_s13 = scalar_lea.vmem (!%p1962_p6), [#allocation2], %s1172_s9  ;;  %p1963_p11 = scmp.ne.s32.totalorder (!%p1962_p6), %s1950_s26, 0 }
  0x70   : > { %1511 = dma.done.wait (%p1963_p11), %s208_s12, 256  }
  0x71   : > { %1513 = vsyncadd (%p1963_p11), %s208_s12, 4294967040  ;;  %p1964_p2 = scmp.eq.s32.totalorder %s1602_s19, 0 }
  0x73   : > { %1515 = dma.done.wait (%p1964_p2), [#allocation6], 1088   ;;  %p1965_p3 = pmov %p1964_p2 }
  0x74   : > { %v1546_v0 = vmov 0.0   ;;  %vm1547_vm0 = vmmov 0   ;;  %v1356_v1 = vld [vmem:[#allocation5] sm:$0xff]   ;;  %v1357_v2 = vld [vmem:[#allocation5 + $0x8] sm:$0xff]   ;;  %v1358_v3 = vld [vmem:[#allocation5 + $0x10] sm:$0xff]   ;;  %vm269_vm1 = vcmask 261120  }
  0x75   : > { %1517 = vsyncadd (%p1965_p3), [#allocation6], 4294966208  ;;  %1223 = vmatprep.subr.bf16.mxu0 %v1546_v0  ;;  %1231 = vmatprep.subr.bf16.mxu1 %v1546_v0  ;;  %v1359_v4 = vld [vmem:[#allocation5 + $0x18] sm:$0xff]   ;;  %v245_v5 = vld [vmem:[%s1754_s13] sm:$0xf]  ;;  %vm545_vm2 = vcmask 326912  }
  0x76   : > { %1227 = vmatprep.mubr.msk.bf16.mxu0 %vm1547_vm0, %v1546_v0  ;;  %1235 = vmatprep.mubr.msk.bf16.mxu1 %vm1547_vm0, %v1546_v0  ;;  %v1360_v6 = vld [vmem:[#allocation5 + $0x20] sm:$0xff]   ;;  %v1362_v8 = vld [vmem:[#allocation5 + $0x30] sm:$0xff]   ;;  %v1361_v9 = vld [vmem:[#allocation5 + $0x28] sm:$0xff]   ;;  %s1548_s26 = smov 96   ;;  %vm556_vm3 = vcmask 64512   ;;  %s1549_s10 = smov 32  }
  0x77   : > { %1224 = vmatpush3.bf16.msra.mxu0 %v1356_v1  ;;  %1232 = vmatpush3.bf16.msra.mxu1 %v1358_v3  ;;  %v1180_v7 = vld [vmem:[%s1754_s13 + $0x4] sm:$0xf]  ;;  %v1363_v10 = vld [vmem:[#allocation5 + $0x38] sm:$0xff]   ;;  %v1176_v13 = vld [vmem:[#allocation7] ss:$0 sm:$0xff]  ;;  %s1550_s7 = smov 64  }
  0x78   : > { %1225 = vmatprep.subr.bf16.mxu0 %v1546_v0  ;;  %1233 = vmatprep.subr.bf16.mxu1 %v1546_v0  ;;  %v1185_v11 = vld [vmem:[%s1754_s13 + $0x8] sm:$0xf]  ;;  %v1190_v12 = vld [vmem:[%s1754_s13 + $0xc] sm:$0xf]  ;;  %v1181_v15 = vld [vmem:[#allocation7 + $0x1] ss:$0 sm:$0xff] }
  0x79   : > { %v1186_v27 = vld [vmem:[#allocation7 + $0x2] ss:$0 sm:$0xff]  ;;  %v1191_v29 = vld [vmem:[#allocation7 + $0x3] ss:$0 sm:$0xff]  ;;  %vm540_vm4 = vcmask 523264   ;;  %vm542_vm5 = vcmask 785408  }
  0x7a   : > { %s1551_s6 = smov 112   ;;  %s1552_s14 = smov 80   ;;  %vm670_vm6 = vcmask 130048   ;;  %vm799_vm7 = vcmask 261248   ;;  %vm928_vm8 = vcmask 392448   ;;  %vm1057_vm9 = vcmask 523648  }
  0x7b   : > { %1226 = vmatpush3.bf16.msra.mxu0 %v1357_v2  ;;  %1234 = vmatpush3.bf16.msra.mxu1 %v1359_v4  ;;  %v544_v2 = vld [vmem:[%s1939_s3] sm:$0xff]  ;;  %s1553_s23 = smov 48   ;;  %s1554_s11 = smov 16   ;;  %vm1059_vm10 = vcmask 1048064  }
  0x7c   : > { %1239 = vmatprep.subr.bf16.mxu0 %v1546_v0  ;;  %1247 = vmatprep.subr.bf16.mxu1 %v1546_v0  ;;  %s1175_s20 = sshll.u32 %s1750_s8, 3  ;;  %s1200_s1 = sshll.u32 %s1602_s19, 7 }
  0x7d   : > { %s1876_s22 = scalar_lea.vmem [#allocation8], %s1175_s20  ;;  %s1889_s12 = scalar_lea.hbm %s1940_s4, %s1200_s1 }
  0x7e   : > { %1228 = vmatmul.mubr.msk.bf16.vlgmr.msra.gmra.mrb[0].mxu0 %vm269_vm1, %v245_v5  ;;  %1236 = vmatmul.mubr.msk.bf16.vlgmr.msra.gmra.mrb[0].mxu1 %vm269_vm1, %v1180_v7  ;;  %s1075_s25 = sshll.u32 %s1876_s22, 4  ;;  %s1062_s13 = scalar_lea.sflag [#allocation4], %s1750_s8  ;;  %s1891_s25 = int_to_ptr.vmem [resolvable:$true] %s1075_s25 }
  0x7f   : > { %1240 = vmatpush3.bf16.msra.mxu0 %v1360_v6  ;;  %1243 = vmatprep.mubr.msk.bf16.mxu0 %vm1547_vm0, %v1546_v0  ;;  %p1966_p9 = scmp.ne.s32.totalorder %s1951_s27, 0  ;;  %s1555_s19 = smov [#allocation8]  }
  0x80   : > { %1241 = vmatprep.subr.bf16.mxu0 %v1546_v0  ;;  %1248 = vmatpush3.bf16.msra.mxu1 %v1362_v8  ;;  %s1470_s29 = sshll.u32 %s1555_s19, 4  ;;  %s1471_s29 = int_to_ptr.vmem [resolvable:$false] %s1470_s29 }
  0x81   : > { %1251 = vmatprep.mubr.msk.bf16.mxu1 %vm1547_vm0, %v1546_v0  ;;  %1249 = vmatprep.subr.bf16.mxu1 %v1546_v0  ;;  %s1472_s30 = scalar_lea.vmem %s1471_s29, 256  ;;  %p1473_p4 = scmp.lt.s32.totalorder %s1891_s25, %s1471_s29 }
  0x83   : > { %1242 = vmatpush3.bf16.msra.mxu0 %v1361_v9 }
  0x84   : > { %1255 = vmatprep.subr.mxu0 %v1546_v0  ;;  %1250 = vmatpush3.bf16.msra.mxu1 %v1363_v10 }
  0x85   : > { %1260 = vmatprep.subr.mxu1 %v1546_v0 }
  0x86   : > { %1244 = vmatmul.mubr.msk.bf16.vlgmr.msra.gmra.mrb[4].mxu0 %vm269_vm1, %v1185_v11 }
  0x87   : > { %1257 = vmatprep.mubr.msk.f32.mxu0 %vm1547_vm0, %v1546_v0  ;;  %1252 = vmatmul.mubr.msk.bf16.vlgmr.msra.gmra.mrb[4].mxu1 %vm269_vm1, %v1190_v12 }
  0x88   : > { %1262 = vmatprep.mubr.msk.f32.mxu1 %vm1547_vm0, %v1546_v0  ;;  %1256 = vmatpush3.msra.mxu0 %v544_v2 }
  0x89   : > { %1261 = vmatpush3.msra.mxu1 %v544_v2  ;;  %1265 = vmatprep.subr.mxu0 %v1546_v0 }
  0x8a   : > { %1270 = vmatprep.subr.mxu1 %v1546_v0 }
 0x151   : > { %v307_v14 = vpop.f32.mrb[0].mxu0  ;;  %v377_v19 = vpop.f32.mrb[0].mxu1 }
 0x152   : > { %v1794_v16 = vadd.f32 %v1176_v13, %v307_v14  ;;  %v1229_v17 = vpop.f32.mrb[1].mxu0  ;;  %v1796_v21 = vadd.f32 %v1181_v15, %v377_v19  ;;  %v1237_v23 = vpop.f32.mrb[1].mxu1 }
 0x153   : > { %v310_v18 = vpop.f32.mrb[2].mxu0  ;;  %v380_v24 = vpop.f32.mrb[2].mxu1 }
 0x154   : > { %v1230_v20 = vpop.f32.mrb[3].mxu0  ;;  %v546_v22 = vsel %vm545_vm2, %v1794_v16, -inf  ;;  %v672_v25 = vsel %vm545_vm2, %v1796_v21, -inf  ;;  %v1238_v26 = vpop.f32.mrb[3].mxu1 }
 0x155   : > { %547 = vmax.xlane.f32.xlu0 %v546_v22  ;;  %v524_v20 = vmax.f32 %v1796_v21, 0.0 }
 0x159   : > { %673 = vmax.xlane.f32.xlu0 %v672_v25  ;;  %v447_v28 = vpop.f32.mrb[4].mxu0 }
 0x15a   : > { %v1802_v30 = vadd.f32 %v1186_v27, %v447_v28  ;;  %v1245_v31 = vpop.f32.mrb[5].mxu0  ;;  %v517_v32 = vpop.f32.mrb[4].mxu1 }
 0x15b   : > { %v450_v33 = vpop.f32.mrb[6].mxu0  ;;  %v1804_v34 = vadd.f32 %v1191_v29, %v517_v32  ;;  %v1253_v37 = vpop.f32.mrb[5].mxu1 }
 0x15c   : > { %v801_v35 = vsel %vm545_vm2, %v1802_v30, -inf  ;;  %v1246_v36 = vpop.f32.mrb[7].mxu0  ;;  %v520_v38 = vpop.f32.mrb[6].mxu1 }
 0x15d   : > { %802 = vmax.xlane.f32.xlu1 %v801_v35  ;;  %v930_v39 = vsel %vm545_vm2, %v1804_v34, -inf  ;;  %v1254_v40 = vpop.f32.mrb[7].mxu1  ;;  %v526_v27 = vmax.f32 %v1804_v34, 0.0  ;;  %v523_v36 = vmax.f32 %v1794_v16, 0.0 }
 0x161   : > { %931 = vmax.xlane.f32.xlu1 %v930_v39 }
 0x1e2   : > { %v548_v41 = vpop.xlane.xlu0 %547 }
 0x1e3   : > { %v549_v42 = vsub.f32 %v1794_v16, %v548_v41 }
 0x1e5   : > { %v550_v43 = vmul.f32 1.442695, %v549_v42 }
 0x1e6   : > { %v674_v44 = vpop.xlane.xlu0 %673 }
 0x1e7   : > { %1364 = vpow2.f32 %v550_v43  ;;  %v675_v45 = vsub.f32 %v1796_v21, %v674_v44  ;;  %v525_v21 = vmax.f32 %v1802_v30, 0.0 }
 0x1e9   : > { %v676_v46 = vmul.f32 1.442695, %v675_v45 }
 0x1ea   : > { %v803_v47 = vpop.xlane.xlu1 %802 }
 0x1eb   : > { %1366 = vpow2.f32 %v676_v46  ;;  %v804_v48 = vsub.f32 %v1802_v30, %v803_v47 }
 0x1ed   : > { %v805_v49 = vmul.f32 1.442695, %v804_v48 }
 0x1ee   : > { %v932_v50 = vpop.xlane.xlu1 %931 }
 0x1ef   : > { %1368 = vpow2.f32 %v805_v49  ;;  %v933_v51 = vsub.f32 %v1804_v34, %v932_v50 }
 0x1f1   : > { %v1365_v52 = vpop.eup %1364  ;;  %v934_v53 = vmul.f32 1.442695, %v933_v51 }
 0x1f2   : > { %553 = vrot.lane.b32.xlu0 %v1365_v52, %s1548_s26 }
 0x1f3   : > { %1370 = vpow2.f32 %v934_v53 }
 0x1f5   : > { %v1367_v54 = vpop.eup %1366 }
 0x1f6   : > { %679 = vrot.lane.b32.xlu1 %v1367_v54, %s1548_s26 }
 0x1f9   : > { %v1369_v55 = vpop.eup %1368 }
 0x1fa   : > { %808 = vrot.lane.b32.xlu1 %v1369_v55, %s1548_s26 }
 0x1fd   : > { %v1371_v56 = vpop.eup %1370 }
 0x1fe   : > { %937 = vrot.lane.b32.xlu1 %v1371_v56, %s1548_s26 }
 0x264   : > { %v554_v57 = vpop.permute.xlu0 %553 }
 0x265   : > { %v557_v58 = vsel %vm556_vm3, %v554_v57, 0.0 }
 0x266   : > { %558 = vadd.xlane.f32.xlu0 %v557_v58 }
 0x268   : > { %v680_v59 = vpop.permute.xlu1 %679 }
 0x269   : > { %v682_v60 = vsel %vm556_vm3, %v680_v59, 0.0 }
 0x26a   : > { %683 = vadd.xlane.f32.xlu1 %v682_v60 }
 0x26c   : > { %v809_v61 = vpop.permute.xlu1 %808 }
 0x26d   : > { %v811_v62 = vsel %vm556_vm3, %v809_v61, 0.0 }
 0x26e   : > { %812 = vadd.xlane.f32.xlu0 %v811_v62 }
 0x270   : > { %v938_v63 = vpop.permute.xlu1 %937 }
 0x271   : > { %v940_v1 = vsel %vm556_vm3, %v938_v63, 0.0 }
 0x272   : > { %941 = vadd.xlane.f32.xlu0 %v940_v1 }
 0x2f3   : > { %v559_v3 = vpop.xlane.xlu0 %558 }
 0x2f4   : > { %1372 = vrcp.f32 %v559_v3 }
 0x2f7   : > { %v684_v4 = vpop.xlane.xlu1 %683 }
 0x2f8   : > { %1374 = vrcp.f32 %v684_v4 }
 0x2fb   : > { %v813_v5 = vpop.xlane.xlu0 %812 }
 0x2fc   : > { %1376 = vrcp.f32 %v813_v5 }
 0x2fe   : > { %v1373_v6 = vpop.eup %1372 }
 0x2ff   : > { %v561_v7 = vmul.f32 %v1373_v6, %v559_v3  ;;  %v942_v8 = vpop.xlane.xlu0 %941 }
 0x300   : > { %1378 = vrcp.f32 %v942_v8 }
 0x301   : > { %v562_v9 = vsub.f32 2.0, %v561_v7 }
 0x302   : > { %v1375_v10 = vpop.eup %1374 }
 0x303   : > { %v563_v11 = vmul.f32 %v1373_v6, %v562_v9  ;;  %v686_v12 = vmul.f32 %v1375_v10, %v684_v4 }
 0x305   : > { %v687_v13 = vsub.f32 2.0, %v686_v12  ;;  %v564_v14 = vmul.f32 %v1365_v52, %v563_v11 }
 0x306   : > { %v1377_v15 = vpop.eup %1376 }
 0x307   : > { %v688_v17 = vmul.f32 %v1375_v10, %v687_v13  ;;  %v815_v18 = vmul.f32 %v1377_v15, %v813_v5  ;;  %566 = vrot.lane.b32.xlu0 %v564_v14, %s1548_s26 }
 0x309   : > { %v816_v19 = vsub.f32 2.0, %v815_v18  ;;  %v689_v22 = vmul.f32 %v1367_v54, %v688_v17 }
 0x30a   : > { %v1379_v23 = vpop.eup %1378 }
 0x30b   : > { %v817_v24 = vmul.f32 %v1377_v15, %v816_v19  ;;  %v944_v25 = vmul.f32 %v1379_v23, %v942_v8  ;;  %528 = vrot.lane.b32.xlu0 %v524_v20, %s1549_s10  ;;  %691 = vrot.lane.b32.xlu1 %v689_v22, %s1548_s26 }
 0x30d   : > { %v945_v26 = vsub.f32 2.0, %v944_v25  ;;  %v818_v28 = vmul.f32 %v1369_v55, %v817_v24 }
 0x30f   : > { %v946_v29 = vmul.f32 %v1379_v23, %v945_v26  ;;  %536 = vrot.lane.b32.xlu0 %v526_v27, %s1548_s26  ;;  %820 = vrot.lane.b32.xlu1 %v818_v28, %s1548_s26 }
 0x311   : > { %v947_v31 = vmul.f32 %v1371_v56, %v946_v29 }
 0x313   : > { %949 = vrot.lane.b32.xlu1 %v947_v31, %s1548_s26 }
 0x317   : > { %532 = vrot.lane.b32.xlu1 %v525_v21, %s1550_s7 }
 0x379   : > { %v567_v32 = vpop.permute.xlu0 %566 }
 0x37a   : > { %1258 = vmatmul.mubr.msk.f32.vlgmr.msra.gmra.mrb[8].mxu0 %vm556_vm3, %v567_v32 }
 0x37b   : > { %1266 = vmatpush3.msra.mxu0 %v544_v2  ;;  %1267 = vmatprep.mubr.msk.f32.mxu0 %vm1547_vm0, %v1546_v0 }
 0x37d   : > { %v692_v33 = vpop.permute.xlu1 %691  ;;  %v529_v35 = vpop.permute.xlu0 %528 }
 0x37e   : > { %1263 = vmatmul.mubr.msk.f32.vlgmr.msra.gmra.mrb[8].mxu1 %vm556_vm3, %v692_v33  ;;  %v539_v38 = vsel %vm269_vm1, %v523_v36, %v529_v35 }
 0x37f   : > { %1271 = vmatpush3.msra.mxu1 %v544_v2  ;;  %1272 = vmatprep.mubr.msk.f32.mxu1 %vm1547_vm0, %v1546_v0 }
 0x381   : > { %v821_v34 = vpop.permute.xlu1 %820  ;;  %v537_v40 = vpop.permute.xlu0 %536 }
 0x382   : > { %1268 = vmatmul.mubr.msk.f32.vlgmr.msra.gmra.mrb[10].mxu0 %vm556_vm3, %v821_v34 }
 0x385   : > { %v950_v30 = vpop.permute.xlu1 %949 }
 0x386   : > { %1273 = vmatmul.mubr.msk.f32.vlgmr.msra.gmra.mrb[10].mxu1 %vm556_vm3, %v950_v30 }
 0x389   : > { %v533_v37 = vpop.permute.xlu1 %532 }
 0x38a   : > { %v541_v39 = vsel %vm540_vm4, %v539_v38, %v533_v37 }
 0x38b   : > { %v543_v41 = vsel %vm542_vm5, %v541_v39, %v537_v40 }
 0x44d   : > { %v636_v42 = vpop.f32.mrb[8].mxu0 }
 0x44e   : > { %v640_v43 = vmul.f32 %v636_v42, %v543_v41  ;;  %v1259_v44 = vpop.f32.mrb[9].mxu0 }
 0x450   : > { %646 = vrot.lane.b32.xlu0 %v640_v43, %s1548_s26  ;;  %642 = vrot.lane.b32.xlu1 %v640_v43, %s1551_s6 }
 0x451   : > { %v761_v45 = vpop.f32.mrb[8].mxu1 }
 0x452   : > { %v1264_v46 = vpop.f32.mrb[9].mxu1  ;;  %v765_v49 = vmul.f32 %v761_v45, %v543_v41 }
 0x454   : > { %654 = vrot.lane.b32.xlu0 %v640_v43, %s1550_s7  ;;  %650 = vrot.lane.b32.xlu1 %v640_v43, %s1552_s14 }
 0x455   : > { %v890_v16 = vpop.f32.mrb[10].mxu0 }
 0x456   : > { %v1269_v47 = vpop.f32.mrb[11].mxu0  ;;  %v894_v51 = vmul.f32 %v890_v16, %v543_v41 }
 0x458   : > { %662 = vrot.lane.b32.xlu0 %v640_v43, %s1549_s10  ;;  %658 = vrot.lane.b32.xlu1 %v640_v43, %s1553_s23 }
 0x459   : > { %v1019_v48 = vpop.f32.mrb[10].mxu1 }
 0x45a   : > { %v1274_v50 = vpop.f32.mrb[11].mxu1  ;;  %v1023_v52 = vmul.f32 %v1019_v48, %v543_v41 }
 0x45c   : > { %767 = vrot.lane.b32.xlu0 %v765_v49, %s1551_s6  ;;  %666 = vrot.lane.b32.xlu1 %v640_v43, %s1554_s11 }
 0x460   : > { %775 = vrot.lane.b32.xlu0 %v765_v49, %s1552_s14  ;;  %771 = vrot.lane.b32.xlu1 %v765_v49, %s1548_s26 }
 0x464   : > { %783 = vrot.lane.b32.xlu0 %v765_v49, %s1553_s23  ;;  %779 = vrot.lane.b32.xlu1 %v765_v49, %s1550_s7 }
 0x468   : > { %791 = vrot.lane.b32.xlu0 %v765_v49, %s1554_s11  ;;  %787 = vrot.lane.b32.xlu1 %v765_v49, %s1549_s10 }
 0x46c   : > { %900 = vrot.lane.b32.xlu1 %v894_v51, %s1548_s26  ;;  %896 = vrot.lane.b32.xlu0 %v894_v51, %s1551_s6 }
 0x470   : > { %908 = vrot.lane.b32.xlu1 %v894_v51, %s1550_s7  ;;  %904 = vrot.lane.b32.xlu0 %v894_v51, %s1552_s14 }
 0x474   : > { %916 = vrot.lane.b32.xlu1 %v894_v51, %s1549_s10  ;;  %912 = vrot.lane.b32.xlu0 %v894_v51, %s1553_s23 }
 0x478   : > { %1029 = vrot.lane.b32.xlu1 %v1023_v52, %s1548_s26  ;;  %920 = vrot.lane.b32.xlu0 %v894_v51, %s1554_s11  ;;  %s1466_s26 = scalar_lea.vmem %s1891_s25, 128 }
 0x479   : > { %p1467_p7 = scmp.ne.s32.totalorder %s1891_s25, %s1466_s26  ;;  %p1474_p0 = scmp.lt.s32.totalorder %s1472_s30, %s1466_s26 }
 0x47b   : > { %p1468_p10 = pnand %p1467_p7, %p1966_p9  ;;  %p1475_p8 = por %p1474_p0, %p1473_p4 }
 0x47c   : > { %1037 = vrot.lane.b32.xlu1 %v1023_v52, %s1550_s7  ;;  %1025 = vrot.lane.b32.xlu0 %v1023_v52, %s1551_s6 }
 0x47d   : > { %p1469_p1 = pneg %p1468_p10 }
 0x47f   : > { %p1476_p5 = pnand %p1475_p8, %p1469_p1 }
 0x480   : > { %1045 = vrot.lane.b32.xlu1 %v1023_v52, %s1549_s10  ;;  %1033 = vrot.lane.b32.xlu0 %v1023_v52, %s1552_s14 }
 0x484   : > { %1041 = vrot.lane.b32.xlu0 %v1023_v52, %s1553_s23 }
 0x488   : > { %1049 = vrot.lane.b32.xlu0 %v1023_v52, %s1554_s11 }
 0x4c2   : > { %v647_v53 = vpop.permute.xlu0 %646  ;;  %v643_v54 = vpop.permute.xlu1 %642 }
 0x4c3   : > { %v645_v55 = vadd.f32 %v643_v54, %v640_v43 }
 0x4c5   : > { %v649_v56 = vadd.f32 %v647_v53, %v645_v55 }
 0x4c6   : > { %v655_v57 = vpop.permute.xlu0 %654  ;;  %v651_v58 = vpop.permute.xlu1 %650 }
 0x4c7   : > { %v653_v59 = vadd.f32 %v651_v58, %v649_v56 }
 0x4c9   : > { %v657_v60 = vadd.f32 %v655_v57, %v653_v59 }
 0x4ca   : > { %v663_v61 = vpop.permute.xlu0 %662  ;;  %v659_v62 = vpop.permute.xlu1 %658 }
 0x4cb   : > { %v661_v63 = vadd.f32 %v659_v62, %v657_v60 }
 0x4cd   : > { %v665_v1 = vadd.f32 %v663_v61, %v661_v63 }
 0x4ce   : > { %v768_v2 = vpop.permute.xlu0 %767  ;;  %v667_v3 = vpop.permute.xlu1 %666 }
 0x4cf   : > { %v669_v4 = vadd.f32 %v667_v3, %v665_v1  ;;  %v770_v5 = vadd.f32 %v768_v2, %v765_v49 }
 0x4d1   : > { %671 = vst.msk [vmem:[%s1876_s22] sm:$0xff] %vm670_vm6, %v669_v4 }
 0x4d2   : > { %v776_v6 = vpop.permute.xlu0 %775  ;;  %v772_v7 = vpop.permute.xlu1 %771 }
 0x4d3   : > { %v774_v8 = vadd.f32 %v772_v7, %v770_v5 }
 0x4d5   : > { %v778_v9 = vadd.f32 %v776_v6, %v774_v8 }
 0x4d6   : > { %v784_v10 = vpop.permute.xlu0 %783  ;;  %v780_v11 = vpop.permute.xlu1 %779 }
 0x4d7   : > { %v782_v12 = vadd.f32 %v780_v11, %v778_v9 }
 0x4d9   : > { %v786_v13 = vadd.f32 %v784_v10, %v782_v12 }
 0x4da   : > { %v792_v14 = vpop.permute.xlu0 %791  ;;  %v788_v15 = vpop.permute.xlu1 %787 }
 0x4db   : > { %v790_v17 = vadd.f32 %v788_v15, %v786_v13 }
 0x4dd   : > { %v794_v18 = vadd.f32 %v792_v14, %v790_v17 }
 0x4de   : > { %v901_v19 = vpop.permute.xlu1 %900  ;;  %v897_v20 = vpop.permute.xlu0 %896 }
 0x4df   : > { %v899_v22 = vadd.f32 %v897_v20, %v894_v51  ;;  %796 = vrot.lane.b32.xlu1 %v794_v18, %s1554_s11 }
 0x4e1   : > { %v903_v23 = vadd.f32 %v901_v19, %v899_v22 }
 0x4e2   : > { %v909_v24 = vpop.permute.xlu1 %908  ;;  %v905_v25 = vpop.permute.xlu0 %904 }
 0x4e3   : > { %v907_v26 = vadd.f32 %v905_v25, %v903_v23 }
 0x4e5   : > { %v911_v27 = vadd.f32 %v909_v24, %v907_v26 }
 0x4e6   : > { %v917_v28 = vpop.permute.xlu1 %916  ;;  %v913_v29 = vpop.permute.xlu0 %912 }
 0x4e7   : > { %v915_v31 = vadd.f32 %v913_v29, %v911_v27 }
 0x4e9   : > { %v919_v21 = vadd.f32 %v917_v28, %v915_v31 }
 0x4ea   : > { %v921_v32 = vpop.permute.xlu0 %920  ;;  %v1030_v34 = vpop.permute.xlu1 %1029 }
 0x4eb   : > { %v923_v33 = vadd.f32 %v921_v32, %v919_v21 }
 0x4ed   : > { %925 = vrot.lane.b32.xlu1 %v923_v33, %s1549_s10 }
 0x4ee   : > { %v1026_v30 = vpop.permute.xlu0 %1025  ;;  %v1038_v37 = vpop.permute.xlu1 %1037 }
 0x4ef   : > { %v1028_v35 = vadd.f32 %v1026_v30, %v1023_v52 }
 0x4f1   : > { %v1032_v36 = vadd.f32 %v1030_v34, %v1028_v35 }
 0x4f2   : > { %v1034_v38 = vpop.permute.xlu0 %1033  ;;  %v1046_v43 = vpop.permute.xlu1 %1045 }
 0x4f3   : > { %v1036_v39 = vadd.f32 %v1034_v38, %v1032_v36 }
 0x4f5   : > { %v1040_v40 = vadd.f32 %v1038_v37, %v1036_v39 }
 0x4f6   : > { %v1042_v41 = vpop.permute.xlu0 %1041 }
 0x4f7   : > { %v1044_v42 = vadd.f32 %v1042_v41, %v1040_v40 }
 0x4f9   : > { %v1048_v44 = vadd.f32 %v1046_v43, %v1044_v42 }
 0x4fa   : > { %v1050_v45 = vpop.permute.xlu0 %1049 }
 0x4fb   : > { %v1052_v46 = vadd.f32 %v1050_v45, %v1048_v44 }
 0x4fd   : > { %1054 = vrot.lane.b32.xlu1 %v1052_v46, %s1553_s23 }
 0x551   : > { %v797_v16 = vpop.permute.xlu1 %796 }
 0x552   : > { %800 = vst.msk [vmem:[%s1876_s22] sm:$0xff] %vm799_vm7, %v797_v16 }
 0x55f   : > { %v926_v47 = vpop.permute.xlu1 %925 }
 0x560   : > { %929 = vst.msk [vmem:[%s1876_s22] sm:$0xff] %vm928_vm8, %v926_v47 }
 0x56f   : > { %v1055_v48 = vpop.permute.xlu1 %1054 }
 0x570   : > { %1058 = vst.msk [vmem:[%s1876_s22] sm:$0xff] %vm1057_vm9, %v1055_v48 }
 0x571   : > { %1060 = vst.msk [vmem:[%s1876_s22] sm:$0xff] %vm1059_vm10, %v1546_v0 }
 0x572   : > { %1479 = shalt.err (!%p1476_p5)
}
 0x573   : > { %s1480_s8 = scalar_lea.hbm %s1889_s12, 128  ;;  %s1484_s6 = scalar_lea.hbm %s1940_s4, 256 }
 0x574   : > { %p1481_p12 = scmp.ne.s32.totalorder %s1889_s12, %s1480_s8  ;;  %p1485_p11 = scmp.lt.u32.totalorder %s1889_s12, %s1940_s4 }
 0x575   : > { %p1486_p2 = scmp.lt.u32.totalorder %s1484_s6, %s1480_s8  ;;  %p1488_p7 = scmp.lt.u32.totalorder %s1480_s8, %s1889_s12 }
 0x576   : > { %p1482_p13 = pnand %p1481_p12, %p1966_p9 }
 0x577   : > { %p1487_p3 = por %p1486_p2, %p1485_p11 }
 0x578   : > { %p1483_p6 = pneg %p1482_p13 }
 0x579   : > { %p1489_p10 = por %p1488_p7, %p1487_p3 }
 0x57b   : > { %p1490_p1 = pnand %p1489_p10, %p1483_p6 }
 0x57d   : > { %1493 = shalt.err (!%p1490_p1)
}
 0x57e   : > { %1285 = dma.vmem_to_hbm [thread:$0]  (%p1966_p9), %s1891_s25, 128, %s1889_s12, %s1062_s13  }
 0x57f PF: > { %s1087_s11 = sand.u32 1, %s1524_s15   ;;  %p1967_p4 = scmp.ne.s32.totalorder %s1952_s28, 0 }
 0x580   : > { %p1968_p0 = scmp.ge.s32.totalorder %s1536_s18, 2  ;;  %s1088_s20 = scalar_lea.sflag [#allocation4], %s1087_s11 }
 0x582   : > { %p1299_p8 = pnand %p1968_p0, %p1967_p4 }
 0x584   : > { %1519 = dma.done.wait (!%p1299_p8), %s1088_s20, 128  }
 0x585   : > { %1521 = vsyncadd (!%p1299_p8), %s1088_s20, 4294967168  ;;  %p18_p5 = scmp.ge.s32.totalorder %s1606_s21, 4   ;;  %s1969_s15 = smov %s1528_s16 }
 0x586   : > { %s1970_s16 = smov %s1532_s17  ;;  %s1971_s17 = smov %s1618_s24 }
 0x587   : > { %s1972_s18 = smov %s1606_s21  ;;  %20 = sbr.rel (!%p18_p5) target bundleno = 8 (0x8), region = 98 }
 0x58e   :  { %1093 = vsyncpa [#allocation3], 1 }
 0x58f   :  { %1095 = vsyncpa [#allocation3 + $0x1], 1 }
 0x590   :  { %1096 = vsyncpa [#allocation6], 1 }
 0x591   :  { %1097 = vsyncpa [#allocation4], 1 }
 0x592   :  { %1099 = vsyncpa [#allocation4 + $0x1], 1 }

</bundles_post_ra>
